<compile_context>
chip_gen: v7x
topology: tpu7x:2x2x1
jax: 0.10.0
libtpu: 0.0.40
codegen_flags: <defaults>
</compile_context>

<pallas_src>
import jax
import jax.numpy as jnp
from jax.experimental import pallas as pl
from jax.experimental.pallas import tpu as pltpu


# --------------------------------------------------------------------------
# helpers
# --------------------------------------------------------------------------
def _vmem_spec():
    return pl.BlockSpec(memory_space=pltpu.MemorySpace.VMEM)


def _pick_time_block(seq_len, hidden, cap=4):
    """Largest time block <= cap that divides T and gives a lane-aligned
    (multiple-of-128) output slab; falls back to the full sequence."""
    for tb in range(min(seq_len, cap), 0, -1):
        if seq_len % tb == 0 and (tb * hidden) % 128 == 0:
            return tb
    return seq_len


# --------------------------------------------------------------------------
# Pallas kernel: Chebyshev support set from the node embeddings (runs once)
# --------------------------------------------------------------------------
def supports_kernel(emb_ref, out_ref):
    # emb: [N, D]  ->  out: [K, N, N]
    emb = emb_ref[...]
    n = emb.shape[0]
    k_total = out_ref.shape[0]
    a = jax.lax.dot_general(emb, emb, (((1,), (1,)), ((), ())),
                            preferred_element_type=jnp.float32)
    a = jnp.maximum(a, 0.0)
    a = a - jnp.max(a, axis=1, keepdims=True)
    e = jnp.exp(a)
    s = e / jnp.sum(e, axis=1, keepdims=True)
    row = jax.lax.broadcasted_iota(jnp.int32, (n, n), 0)
    col = jax.lax.broadcasted_iota(jnp.int32, (n, n), 1)
    eye = jnp.where(row == col, 1.0, 0.0).astype(jnp.float32)
    sup = [eye, s]
    for _ in range(2, k_total):
        sup.append(2.0 * jnp.dot(s, sup[-1], preferred_element_type=jnp.float32)
                   - sup[-2])
    for k in range(k_total):
        out_ref[k] = sup[k]


def compute_supports(node_embeddings, cheb_k):
    n = node_embeddings.shape[0]
    return pl.pallas_call(
        supports_kernel,
        out_shape=jax.ShapeDtypeStruct((cheb_k, n, n), jnp.float32),
        in_specs=[_vmem_spec()],
        out_specs=_vmem_spec(),
    )(node_embeddings)


# --------------------------------------------------------------------------
# Pallas kernel: hoisted x-path (state independent, fully parallel over (b,t))
# --------------------------------------------------------------------------
def _make_xpath_kernel(cheb_k, embed_dim, hidden):
    width = 3 * hidden                      # [gate 2H | update H]

    def kernel(x_ref, sup_ref, wx_ref, emb_ref, b3_ref, gxr_ref):
        # x_ref: [N, Cin]; sup: [K, N, N]; wx: [K*Cin, D*3H];
        # emb: [N, D]; b3: [N, 3H]; gxr: [N, 3H]
        x = x_ref[...]
        # graph propagation of the x features: K plain 2-D MXU matmuls
        px = jnp.concatenate(
            [jnp.dot(sup_ref[k], x, preferred_element_type=jnp.float32)
             for k in range(cheb_k)], axis=1)                    # [N, K*Cin]
        # pool-first node-adaptive contraction against [Wg_x | Wu_x]
        y = jnp.dot(px, wx_ref[...],
                    preferred_element_type=jnp.float32)          # [N, D*3H]
        emb = emb_ref[...]
        g = b3_ref[...]                                          # bias folded in
        for d in range(embed_dim):
            g = g + y[:, d * width:(d + 1) * width] * emb[:, d:d + 1]
        gxr_ref[...] = g

    return kernel


def xpath_precompute(x4, supports, w3x, emb, bias3):
    """x4: [B, T, N, Cin] -> gxr: [B, T, N, 3H] (x-path + node bias)."""
    B, T, N, C = x4.shape
    K = supports.shape[0]
    D = emb.shape[1]
    width = bias3.shape[1]
    hidden = width // 3
    kernel = _make_xpath_kernel(K, D, hidden)
    return pl.pallas_call(
        kernel,
        out_shape=jax.ShapeDtypeStruct((B, T, N, width), jnp.float32),
        grid_spec=pltpu.PrefetchScalarGridSpec(
            num_scalar_prefetch=0,
            grid=(B, T),
            in_specs=[
                pl.BlockSpec((None, None, N, C), lambda b, t: (b, t, 0, 0)),
                pl.BlockSpec((K, N, N), lambda b, t: (0, 0, 0)),     # resident
                pl.BlockSpec(w3x.shape, lambda b, t: (0, 0)),        # resident
                pl.BlockSpec(emb.shape, lambda b, t: (0, 0)),        # resident
                pl.BlockSpec(bias3.shape, lambda b, t: (0, 0)),      # resident
            ],
            out_specs=pl.BlockSpec((None, None, N, width),
                                   lambda b, t: (b, t, 0, 0)),
        ),
        compiler_params=pltpu.CompilerParams(
            dimension_semantics=("parallel", "parallel"),
            vmem_limit_bytes=48 * 1024 * 1024,
        ),
    )(x4, supports, w3x, emb, bias3)


# --------------------------------------------------------------------------
# Pallas kernel: serial GRU sweep (only the state-dependent half of the cell)
# --------------------------------------------------------------------------
def _make_recurrent_kernel(tb, hidden, embed_dim, cheb_k, cdt):
    two_h = 2 * hidden

    def kernel(gxr_ref, h0_ref, sup_ref, emb_ref, wg_ref, wu_ref, out_ref,
               h_scr):
        # gxr_ref: [tb, N, 3H] f32  (precomputed x-path + bias, streamed)
        # h0_ref : [N, H] f32
        # sup_ref: [K, N, N]  (compute dtype, resident)
        # emb_ref: [N, D] f32 (resident)
        # wg_ref : [K, H, D*2H], wu_ref: [K, H, D*H]  (compute dtype, resident)
        # out_ref: [N, tb*H] f32
        # h_scr  : VMEM [N, H] f32 recurrent state, carried across time blocks
        i = pl.program_id(1)

        @pl.when(i == 0)
        def _init():
            h_scr[...] = h0_ref[...]

        n = h0_ref.shape[0]
        emb = emb_ref[...]
        # hoisted once per grid step: embedding broadcast columns for the
        # node-adaptive reduction, reused by every timestep / both gates
        e_g = [jnp.broadcast_to(emb[:, d:d + 1], (n, two_h))
               for d in range(embed_dim)]
        e_u = [jnp.broadcast_to(emb[:, d:d + 1], (n, hidden))
               for d in range(embed_dim)]

        h = h_scr[...]
        outs = []
        for j in range(tb):                         # static unrolled time loop
            g3 = gxr_ref[j]                         # [N, 3H]
            # ---------------- gate (z | r) ---------------------------------
            h_c = h.astype(cdt)
            yg = None
            for k in range(cheb_k):
                ph_k = jnp.dot(sup_ref[k], h_c,
                               preferred_element_type=jnp.float32)     # [N, H]
                part = jnp.dot(ph_k.astype(cdt), wg_ref[k],
                               preferred_element_type=jnp.float32)     # [N, D*2H]
                yg = part if yg is None else yg + part
            g = g3[:, :two_h]
            for d in range(embed_dim):
                g = g + yg[:, d * two_h:(d + 1) * two_h] * e_g[d]
            zr = 1.0 / (1.0 + jnp.exp(-g))          # exact sigmoid, f32
            z = zr[:, :hidden]
            r = zr[:, hidden:]
            # ---------------- candidate ------------------------------------
            zh_c = (z * h).astype(cdt)
            yu = None
            for k in range(cheb_k):
                pz_k = jnp.dot(sup_ref[k], zh_c,
                               preferred_element_type=jnp.float32)
                part = jnp.dot(pz_k.astype(cdt), wu_ref[k],
                               preferred_element_type=jnp.float32)     # [N, D*H]
                yu = part if yu is None else yu + part
            u = g3[:, two_h:]
            for d in range(embed_dim):
                u = u + yu[:, d * hidden:(d + 1) * hidden] * e_u[d]
            hc = jnp.tanh(u)
            h = r * h + (1.0 - r) * hc
            outs.append(h)

        h_scr[...] = h
        out_ref[...] = jnp.concatenate(outs, axis=1)   # one lane-dense store

    return kernel


def agcrn_recurrent(gxr, h0, supports_c, emb, wgh_c, wuh_c, compute_dtype):
    """gxr: [B, T, N, 3H], h0: [B, N, H] -> out: [B, N, T*H]."""
    B, T, N, width = gxr.shape
    hidden = width // 3
    K = supports_c.shape[0]
    D = emb.shape[1]
    tb = _pick_time_block(T, hidden)
    kernel = _make_recurrent_kernel(tb, hidden, D, K, compute_dtype)
    return pl.pallas_call(
        kernel,
        out_shape=jax.ShapeDtypeStruct((B, N, T * hidden), jnp.float32),
        grid_spec=pltpu.PrefetchScalarGridSpec(
            num_scalar_prefetch=0,
            grid=(B, T // tb),
            in_specs=[
                pl.BlockSpec((None, tb, N, width), lambda b, i: (b, i, 0, 0)),
                pl.BlockSpec((None, N, hidden), lambda b, i: (b, 0, 0)),
                pl.BlockSpec((K, N, N), lambda b, i: (0, 0, 0)),     # resident
                pl.BlockSpec(emb.shape, lambda b, i: (0, 0)),        # resident
                pl.BlockSpec(wgh_c.shape, lambda b, i: (0, 0, 0)),   # resident
                pl.BlockSpec(wuh_c.shape, lambda b, i: (0, 0, 0)),   # resident
            ],
            out_specs=pl.BlockSpec((None, N, tb * hidden),
                                   lambda b, i: (b, 0, i)),
            scratch_shapes=[pltpu.VMEM((N, hidden), jnp.float32)],
        ),
        compiler_params=pltpu.CompilerParams(
            dimension_semantics=("parallel", "arbitrary"),
            vmem_limit_bytes=48 * 1024 * 1024,
        ),
    )(gxr, h0, supports_c, emb, wgh_c, wuh_c)


# --------------------------------------------------------------------------
# Full AVWDCRNN forward
# --------------------------------------------------------------------------
def avwdcrnn_forward(x, init_state, node_embeddings, params, cheb_k,
                     compute_dtype=jnp.float32):
    """x: [B, T, N, C_in], init_state: [L, B, N, H], node_embeddings: [N, D]."""
    B, T, N, _ = x.shape
    D = node_embeddings.shape[1]
    supports = compute_supports(node_embeddings, cheb_k)      # [K, N, N] f32
    supports_c = supports.astype(compute_dtype)

    cur = x                                                   # [B, T, N, C]
    hidden_out = []
    for li, p in enumerate(params):
        C = cur.shape[-1]
        H = p["bu"].shape[-1]
        Wg, bg, Wu, bu = p["Wg"], p["bg"], p["Wu"], p["bu"]
        # one-time host-side weight-pool re-layout:
        #   w3x  : rows (k, c over x-channels), cols (d, [gate 2H | update H])
        #   wgh/wuh : per-k [H, D*O] pools for the h-channel rows
        #   bias3: node bias emb @ [bg | bu], folded into the precomputed stream
        w3 = jnp.concatenate([Wg, Wu], axis=-1)               # [D, K, C+H, 3H]
        w3x = jnp.transpose(w3[:, :, :C, :], (1, 2, 0, 3)).reshape(
            cheb_k * C, D * 3 * H)
        wgh = jnp.transpose(Wg[:, :, C:, :], (1, 2, 0, 3)).reshape(
            cheb_k, H, D * 2 * H)
        wuh = jnp.transpose(Wu[:, :, C:, :], (1, 2, 0, 3)).reshape(
            cheb_k, H, D * H)
        bias3 = jnp.concatenate([node_embeddings @ bg, node_embeddings @ bu],
                                axis=-1)                      # [N, 3H]

        # state-independent half of the cell for the whole sequence
        gxr = xpath_precompute(cur, supports, w3x, node_embeddings, bias3)

        # serial GRU sweep (state carried in VMEM scratch)
        out_flat = agcrn_recurrent(gxr, init_state[li], supports_c,
                                   node_embeddings,
                                   wgh.astype(compute_dtype),
                                   wuh.astype(compute_dtype),
                                   compute_dtype)             # [B, N, T*H]
        out4 = out_flat.reshape(B, N, T, H).transpose(0, 2, 1, 3)  # [B,T,N,H]
        hidden_out.append(out4[:, -1])                        # [B, N, H]
        cur = out4
    return cur, hidden_out


# --------------------------------------------------------------------------
# Pure-JAX reference (mirrors the PyTorch module) for a correctness check
# --------------------------------------------------------------------------
def _avwgcn_ref(x, emb, w_pool, b_pool, cheb_k):
    n = emb.shape[0]
    a = jnp.maximum(emb @ emb.T, 0.0)
    s = jax.nn.softmax(a, axis=1)
    sup = [jnp.eye(n, dtype=jnp.float32), s]
    for _ in range(2, cheb_k):
        sup.append(2.0 * s @ sup[-1] - sup[-2])
    supports = jnp.stack(sup, axis=0)
    weights = jnp.einsum("nd,dkio->nkio", emb, w_pool)
    bias = emb @ b_pool
    x_g = jnp.einsum("knm,bmc->bknc", supports, x)
    x_g = jnp.transpose(x_g, (0, 2, 1, 3))
    return jnp.einsum("bnki,nkio->bno", x_g, weights) + bias


def _cell_ref(x, h, emb, p, cheb_k):
    hidden = h.shape[-1]
    cat = jnp.concatenate([x, h], axis=-1)
    zr = jax.nn.sigmoid(_avwgcn_ref(cat, emb, p["Wg"], p["bg"], cheb_k))
    z, r = zr[..., :hidden], zr[..., hidden:]
    cand = jnp.concatenate([x, z * h], axis=-1)
    hc = jnp.tanh(_avwgcn_ref(cand, emb, p["Wu"], p["bu"], cheb_k))
    return r * h + (1.0 - r) * hc


def forward_ref(x, init_state, emb, params, cheb_k):
    B, T, N, _ = x.shape
    current = x
    hidden_out = []
    for li, p in enumerate(params):
        h = init_state[li]
        states = []
        for t in range(T):
            h = _cell_ref(current[:, t], h, emb, p, cheb_k)
            states.append(h)
        hidden_out.append(h)
        current = jnp.stack(states, axis=1)
    return current, hidden_out


# --------------------------------------------------------------------------
if __name__ == "__main__":
    B, T, N = 2, 8, 16
    DIM_IN, HIDDEN, CHEB_K, EMBED, LAYERS = 2, 32, 3, 8, 2

    key = jax.random.PRNGKey(0)
    k_x, k_e, k_h, k_p = jax.random.split(key, 4)
    x = jax.random.normal(k_x, (B, T, N, DIM_IN), dtype=jnp.float32)
    node_embeddings = jax.random.normal(k_e, (N, EMBED), dtype=jnp.float32)
    init_state = 0.1 * jax.random.normal(k_h, (LAYERS, B, N, HIDDEN),
                                         dtype=jnp.float32)

    params = []
    pk = k_p
    for li in range(LAYERS):
        ci = DIM_IN if li == 0 else HIDDEN
        pk, k1, k2, k3, k4 = jax.random.split(pk, 5)
        params.append(dict(
            Wg=0.1 * jax.random.normal(k1, (EMBED, CHEB_K, ci + HIDDEN, 2 * HIDDEN), jnp.float32),
            bg=0.1 * jax.random.normal(k2, (EMBED, 2 * HIDDEN), jnp.float32),
            Wu=0.1 * jax.random.normal(k3, (EMBED, CHEB_K, ci + HIDDEN, HIDDEN), jnp.float32),
            bu=0.1 * jax.random.normal(k4, (EMBED, HIDDEN), jnp.float32),
        ))

    # f32 (PyTorch-equivalent numerics) path
    out, hidden = avwdcrnn_forward(x, init_state, node_embeddings, params, CHEB_K)
    out = jax.block_until_ready(out)
    hidden = [jax.block_until_ready(h) for h in hidden]

    ref_out, ref_hidden = forward_ref(x, init_state, node_embeddings, params, CHEB_K)
    assert out.shape == (B, T, N, HIDDEN)
    assert jnp.allclose(out, ref_out, rtol=2e-3, atol=2e-3), \
        float(jnp.max(jnp.abs(out - ref_out)))
    for h, rh in zip(hidden, ref_hidden):
        assert h.shape == (B, N, HIDDEN)
        assert jnp.allclose(h, rh, rtol=2e-3, atol=2e-3)

    # bf16 fast path: only MXU operands (supports, weight pools, state) are
    # bf16; accumulation, activations and the GRU blend stay f32.
    out_fast, hidden_fast = avwdcrnn_forward(
        x, init_state, node_embeddings, params, CHEB_K,
        compute_dtype=jnp.bfloat16)
    out_fast = jax.block_until_ready(out_fast)
    assert jnp.allclose(out_fast, ref_out, rtol=1e-1, atol=1e-1), \
        float(jnp.max(jnp.abs(out_fast - ref_out)))
    for h, rh in zip(hidden_fast, ref_hidden):
        assert jnp.allclose(h, rh, rtol=1e-1, atol=1e-1)

    print("KERNEL_OK")
</pallas_src>

<mosaic_0001>
module attributes {stable_mosaic.version = 11 : i64} {
  func.func @supports_kernel(%arg0: memref<16x8xf32, #tpu.memory_space<vmem>>, %arg1: memref<3x16x16xf32, #tpu.memory_space<vmem>>) attributes {dimension_semantics = [], scalar_prefetch = 0 : i64, scratch_operands = 0 : i64, tpu.core_type = #tpu.core_type<tc>} {
    %c0 = arith.constant 0 : index
    %c0_0 = arith.constant 0 : index
    %0 = vector.load %arg0[%c0, %c0_0] : memref<16x8xf32, #tpu.memory_space<vmem>>, vector<16x8xf32>
    %cst = arith.constant dense<0.000000e+00> : vector<16x16xf32>
    %1 = tpu.matmul %0, %0, %cst {dimension_numbers = #tpu.dot_dimension_numbers<[1], [1], [0], [0], [0, 0, 1, 0], [], []>} : vector<16x8xf32>, vector<16x8xf32>, vector<16x16xf32> -> vector<16x16xf32>
    %cst_1 = arith.constant 0.000000e+00 : f32
    %2 = vector.broadcast %cst_1 : f32 to vector<16x16xf32>
    %3 = arith.maximumf %1, %2 : vector<16x16xf32>
    %cst_2 = arith.constant dense<0xFF800000> : vector<16xf32>
    %4 = vector.multi_reduction <maximumf>, %3, %cst_2 [1] : vector<16x16xf32> to vector<16xf32>
    %5 = vector.shape_cast %4 : vector<16xf32> to vector<16x1xf32>
    %6 = vector.broadcast %5 : vector<16x1xf32> to vector<16x16xf32>
    %7 = arith.subf %3, %6 : vector<16x16xf32>
    %8 = math.exp %7 : vector<16x16xf32>
    %cst_3 = arith.constant dense<0.000000e+00> : vector<16xf32>
    %9 = vector.multi_reduction <add>, %8, %cst_3 [1] : vector<16x16xf32> to vector<16xf32>
    %10 = vector.shape_cast %9 : vector<16xf32> to vector<16x1xf32>
    %11 = vector.broadcast %10 : vector<16x1xf32> to vector<16x16xf32>
    %12 = arith.divf %8, %11 : vector<16x16xf32>
    %13 = tpu.iota {dimensions = array<i32: 0>} : vector<16x16xi32>
    %14 = tpu.iota {dimensions = array<i32: 1>} : vector<16x16xi32>
    %15 = arith.cmpi eq, %13, %14 : vector<16x16xi32>
    %cst_4 = arith.constant 1.000000e+00 : f32
    %cst_5 = arith.constant 0.000000e+00 : f32
    %16 = vector.broadcast %cst_4 : f32 to vector<16x16xf32>
    %17 = vector.broadcast %cst_5 : f32 to vector<16x16xf32>
    %18 = arith.select %15, %16, %17 : vector<16x16xi1>, vector<16x16xf32>
    %cst_6 = arith.constant dense<0.000000e+00> : vector<16x16xf32>
    %19 = tpu.matmul %12, %12, %cst_6 {dimension_numbers = #tpu.dot_dimension_numbers<[1], [0], [0], [1], [0, 0, 1, 1], [], []>} : vector<16x16xf32>, vector<16x16xf32>, vector<16x16xf32> -> vector<16x16xf32>
    %cst_7 = arith.constant 2.000000e+00 : f32
    %20 = vector.broadcast %cst_7 : f32 to vector<16x16xf32>
    %21 = arith.mulf %20, %19 : vector<16x16xf32>
    %22 = arith.subf %21, %18 : vector<16x16xf32>
    %c0_8 = arith.constant 0 : index
    %c0_9 = arith.constant 0 : index
    %c0_10 = arith.constant 0 : index
    %23 = vector.load %arg1[%c0_8, %c0_9, %c0_10] : memref<3x16x16xf32, #tpu.memory_space<vmem>>, vector<1x16x16xf32>
    %24 = vector.shape_cast %23 : vector<1x16x16xf32> to vector<16x16xf32>
    %25 = vector.shape_cast %18 : vector<16x16xf32> to vector<1x16x16xf32>
    tpu.vector_store %arg1[%c0_8, %c0_9, %c0_10], %25 {strides = array<i32>} : memref<3x16x16xf32, #tpu.memory_space<vmem>>, vector<1x16x16xf32>,
    %c1 = arith.constant 1 : index
    %c0_11 = arith.constant 0 : index
    %c0_12 = arith.constant 0 : index
    %26 = vector.load %arg1[%c1, %c0_11, %c0_12] : memref<3x16x16xf32, #tpu.memory_space<vmem>>, vector<1x16x16xf32>
    %27 = vector.shape_cast %26 : vector<1x16x16xf32> to vector<16x16xf32>
    %28 = vector.shape_cast %12 : vector<16x16xf32> to vector<1x16x16xf32>
    tpu.vector_store %arg1[%c1, %c0_11, %c0_12], %28 {strides = array<i32>} : memref<3x16x16xf32, #tpu.memory_space<vmem>>, vector<1x16x16xf32>,
    %c2 = arith.constant 2 : index
    %c0_13 = arith.constant 0 : index
    %c0_14 = arith.constant 0 : index
    %29 = vector.load %arg1[%c2, %c0_13, %c0_14] : memref<3x16x16xf32, #tpu.memory_space<vmem>>, vector<1x16x16xf32>
    %30 = vector.shape_cast %29 : vector<1x16x16xf32> to vector<16x16xf32>
    %31 = vector.shape_cast %22 : vector<16x16xf32> to vector<1x16x16xf32>
    tpu.vector_store %arg1[%c2, %c0_13, %c0_14], %31 {strides = array<i32>} : memref<3x16x16xf32, #tpu.memory_space<vmem>>, vector<1x16x16xf32>,
    return
  }
}

</mosaic_0001>

<bundles_post_ra>
// kernel: tpu_custom_call.1
= control target key start
LH: loop header
LB: loop body
LE: loop exit
PB: predicated region body
PF: predicated region fallthrough
CT: control target
= control target key end

     0   :  { %vm11_vm0 = vcmask 64512   ;;  %s354_s0 = inlined_call_operand.vmem [shape: f32[16,8], index: 0, kind: input, shape index: {}]   ;;  %s355_s1 = inlined_call_operand.hbm [shape: f32[3,16,16], index: 1, kind: output, shape index: {}]  }
   0x1   :  { %v9_v0 = vld [vmem:[%s354_s0] sm:$0xff]  ;;  %v10_v1 = vld [vmem:[%s354_s0 + $0x8] sm:$0xff] }
   0x2   :  { %6 = vsyncpa [#allocation3], 0  ;;  %v264_v2 = vpack.c.bf16 %v10_v1, %v9_v0  ;;  %254 = vmatprep.mubr.msk.f32.mxu0 %vm11_vm0, %v9_v0  ;;  %vm95_vm2 = vcmask 130048   ;;  %v118_v19 = vlaneseq  ;;  %v310_v23 = vmov 0.0   ;;  %s311_s0 = smov [#allocation2]  }
   0x3   :  { %vm265_vm1 = vmpackc.low %vm11_vm0, %vm11_vm0  ;;  %s225_s10 = sshll.u32 %s311_s0, 4  ;;  %s226_s10 = int_to_ptr.vmem [resolvable:$true] %s225_s10 }
   0x4   :  { %266 = vmatprep.subr.msk.bf16.mxu0 %vm265_vm1, %v264_v2  ;;  %v119_v20 = vshrl.u32 %v118_v19, 7  ;;  %v122_v21 = vand.u32 127, %v118_v19  ;;  %s286_s11 = scalar_lea.vmem %s226_s10, 768  ;;  %p291_p1 = scmp.lt.s32.totalorder %s226_s10, %s226_s10 }
   0x5   :  { %269 = vmatpush3.bf16.xpose.msk.msra.mxu0 %vm265_vm1, %v264_v2  ;;  %p287_p0 = scmp.ne.s32.totalorder %s226_s10, %s286_s11  ;;  %p292_p2 = scmp.lt.s32.totalorder %s286_s11, %s286_s11 }
   0x6   :  { %v120_v22 = vadd.s32 8, %v119_v20  ;;  %vm123_vm4 = vcmp.eq.s32.totalorder %v119_v20, %v122_v21 }
   0x7   :  { %v125_v32 = vsel %vm123_vm4, 1.0, %v310_v23  ;;  %p293_p3 = por %p292_p2, %p291_p1 }
   0x8   :  { %vm124_vm3 = vcmp.eq.s32.totalorder %v120_v22, %v122_v21  ;;  %212 = vst.msk [vmem:[#allocation2] sm:$0xff] %vm95_vm2, %v125_v32 }
   0x9   :  { %v126_v24 = vsel %vm124_vm3, 1.0, %v310_v23  ;;  %p294_p4 = pnand %p293_p3, %p287_p0 }
   0xa   :  { %213 = vst.msk [vmem:[#allocation2 + $0x8] sm:$0xff] %vm95_vm2, %v126_v24 }
   0xc   :  { %255 = vmatmul.mubr.msk.f32.vlgmr.msra.gmra.mrb[0].mxu0 %vm11_vm0, %v10_v1 }
  0xdf   :  { %v256_v3 = vpop.f32.mrb[0].mxu0 }
  0xe0   :  { %v84_v4 = vpop.f32.mrb[1].mxu0  ;;  %v94_v6 = vmax.f32 %v256_v3, 0.0 }
  0xe1   :  { %v93_v5 = vmax.f32 %v84_v4, 0.0 }
  0xe2   :  { %v99_v8 = vsel %vm95_vm2, %v94_v6, -inf }
  0xe3   :  { %v96_v7 = vsel %vm95_vm2, %v93_v5, -inf }
  0xe4   :  { %97 = vmax.xlane.f32.xlu0 %v96_v7 }
  0xe8   :  { %100 = vmax.xlane.f32.xlu0 %v99_v8 }
 0x171   :  { %v98_v9 = vpop.xlane.xlu0 %97 }
 0x172   :  { %v102_v10 = vsub.f32 %v93_v5, %v98_v9 }
 0x174   :  { %v104_v11 = vmul.f32 1.442695, %v102_v10 }
 0x175   :  { %v101_v12 = vpop.xlane.xlu0 %100 }
 0x176   :  { %278 = vpow2.f32 %v104_v11  ;;  %v103_v13 = vsub.f32 %v94_v6, %v101_v12 }
 0x178   :  { %v106_v14 = vmul.f32 1.442695, %v103_v13 }
 0x17a   :  { %280 = vpow2.f32 %v106_v14 }
 0x180   :  { %v279_v15 = vpop.eup %278 }
 0x181   :  { %v108_v16 = vsel %vm95_vm2, %v279_v15, 0.0 }
 0x182   :  { %109 = vadd.xlane.f32.xlu1 %v108_v16 }
 0x184   :  { %v281_v17 = vpop.eup %280 }
 0x185   :  { %v111_v18 = vsel %vm95_vm2, %v281_v17, 0.0 }
 0x186   :  { %112 = vadd.xlane.f32.xlu1 %v111_v18 }
 0x20f   :  { %v110_v25 = vpop.xlane.xlu1 %109 }
 0x210   :  { %282 = vrcp.f32 %v110_v25 }
 0x213   :  { %v113_v26 = vpop.xlane.xlu1 %112 }
 0x214   :  { %284 = vrcp.f32 %v113_v26 }
 0x21a   :  { %v283_v27 = vpop.eup %282 }
 0x21b   :  { %v115_v28 = vmul.f32 %v283_v27, %v279_v15 }
 0x21d   :  { %261 = vmatprep.mubr.msk.f32.mxu1 %vm95_vm2, %v115_v28  ;;  %215 = vst.msk [vmem:[#allocation2 + $0x10] sm:$0xff] %vm95_vm2, %v115_v28 }
 0x21e   :  { %v285_v29 = vpop.eup %284 }
 0x21f   :  { %v117_v30 = vmul.f32 %v285_v29, %v281_v17 }
 0x221   :  { %v270_v31 = vpack.c.bf16 %v117_v30, %v115_v28  ;;  %216 = vst.msk [vmem:[#allocation2 + $0x18] sm:$0xff] %vm95_vm2, %v117_v30 }
 0x223   :  { %271 = vmatprep.subr.bf16.mxu1 %v270_v31 }
 0x224   :  { %273 = vmatpush3.bf16.msra.mxu1 %v270_v31 }
 0x227   :  { %262 = vmatmul.mubr.msk.f32.vlgmr.msra.gmra.mrb[0].mxu1 %vm95_vm2, %v117_v30 }
 0x2fa   :  { %v263_v33 = vpop.f32.mrb[0].mxu1 }
 0x2fb   :  { %v209_v34 = vmul.f32 2.0, %v263_v33  ;;  %v199_v35 = vpop.f32.mrb[1].mxu1 }
 0x2fc   :  { %v208_v36 = vmul.f32 2.0, %v199_v35 }
 0x2fd   :  { %v211_v37 = vsub.f32 %v209_v34, %v126_v24 }
 0x2fe   :  { %v210_v38 = vsub.f32 %v208_v36, %v125_v32 }
 0x2ff   :  { %219 = vst.msk [vmem:[#allocation2 + $0x28] sm:$0xff] %vm95_vm2, %v211_v37 }
 0x300   :  { %218 = vst.msk [vmem:[#allocation2 + $0x20] sm:$0xff] %vm95_vm2, %v210_v38 }
 0x301   :  { %297 = shalt.err (!%p294_p4)
}
 0x302   :  { %s298_s14 = scalar_lea.hbm %s355_s1, 768 }
 0x303   :  { %p299_p5 = scmp.ne.s32.totalorder %s355_s1, %s298_s14  ;;  %p302_p6 = scmp.lt.u32.totalorder %s298_s14, %s355_s1 }
 0x305   :  { %p304_p7 = pnand %p302_p6, %p299_p5 }
 0x307   :  { %307 = shalt.err (!%p304_p7)
}
 0x308   :  { %s312_s19 = smov 128   ;;  %s313_s20 = smov 8  }
 0x309   :  { %231 = dma.vmem_to_hbm [thread:$0]  %s226_s10, 768, %s355_s1, [#allocation3], %s312_s19, %s312_s19, %s313_s20  }
 0x30a   :  { %308 = dma.done.wait [#allocation3], 768  }
 0x30b   :  { %309 = vsyncadd [#allocation3], 4294966528 }
 0x30c   :  { %235 = vsyncpa [#allocation3], 1 }

</bundles_post_ra>
